<compile_context>
chip_gen: v7x
topology: tpu7x:2x2x1
jax: 0.10.0
libtpu: 0.0.40
codegen_flags: <defaults>
</compile_context>

<pallas_src>
import jax
import jax.numpy as jnp
from jax import lax
from jax.experimental import pallas as pl
from jax.experimental.pallas import tpu as pltpu


def _sublane_group_sum(x):
    """Reduce (ti, tj) -> (8, tj), ti % 8 == 0, by a pairwise tree of adds of
    aligned 8-row slices: pure VALU, no XLU cross-lane/cross-sublane work."""
    ti, tj = x.shape
    parts = [x[r * 8:(r + 1) * 8, :] for r in range(ti // 8)]
    while len(parts) > 1:
        nxt = [parts[k] + parts[k + 1] for k in range(0, len(parts) - 1, 2)]
        if len(parts) % 2:
            nxt.append(parts[-1])
        parts = nxt
    return parts[0]


def _accumulate(acc_ref, x):
    """Accumulate x (ti, tj) into the lane-shaped acc scratch (8, tj)."""
    ti, tj = x.shape
    if ti % 8 == 0:
        acc_ref[...] += _sublane_group_sum(x)
    else:
        # Rare fallback: single full-width block with D not a multiple of 8.
        acc_ref[0:1, :] += jnp.sum(x, axis=0, keepdims=True)


def _make_cc_loss_kernel(lmbda: float):
    def kernel(n1_ref, n2_ref, out_ref, acc_sq_ref, acc_dg_ref):
        i = pl.program_id(0)      # row tile of cc (z1 feature block)
        j = pl.program_id(1)      # col tile of cc (z2 feature block)
        nj = pl.num_programs(1)

        @pl.when(j == 0)
        def _init():
            acc_sq_ref[...] = jnp.zeros_like(acc_sq_ref)
            acc_dg_ref[...] = jnp.zeros_like(acc_dg_ref)

        # cc tile: contract over the batch axis (K = B) on the MXU.
        # The 1/B factor is already folded into the n1 operand.
        cc = lax.dot_general(
            n1_ref[...], n2_ref[...],
            dimension_numbers=(((0,), (0,)), ((), ())),
            preferred_element_type=jnp.float32,
        )

        # Every tile: accumulate sum(cc^2); lmbda is applied once at finalize.
        _accumulate(acc_sq_ref, cc * cc)

        # Block-diagonal tiles only: diagonal correction with local iotas
        # (square tiles => the local diagonal IS the global diagonal).
        @pl.when(i == j)
        def _diag():
            ti, tj = cc.shape
            row = lax.broadcasted_iota(jnp.int32, (ti, tj), 0)
            col = lax.broadcasted_iota(jnp.int32, (ti, tj), 1)
            corr = jnp.where(row == col,
                             (1.0 - cc) ** 2 - lmbda * (cc * cc),
                             0.0)
            _accumulate(acc_dg_ref, corr)

        @pl.when(j == nj - 1)
        def _finalize():
            out_ref[...] = lmbda * acc_sq_ref[...] + acc_dg_ref[...]

    return kernel


def _vmem_estimate(b: int, ft: int, mm_itemsize: int) -> int:
    return (2 * 2 * b * ft * mm_itemsize   # n1/n2 blocks, double-buffered
            + 3 * ft * ft * 4              # cc / cc^2 / epilogue f32 temps
            + 2 * 8 * ft * 4               # lane-shaped accumulators
            + 2 * 8 * ft * 4)              # per-row output block, double-buffered


def _vmem_cap_bytes() -> int:
    # Stay well under physical per-TC VMEM (v7x: 64 MiB) so Mosaic keeps room
    # for its internal scratch / semaphores; larger caps on v5e/v6e (128 MiB).
    try:
        phys = int(pltpu.get_tpu_info().vmem_capacity_bytes)
        return min(max(phys - (16 << 20), 32 << 20), 96 << 20)
    except Exception:
        return 48 << 20


def _pick_feature_tile(d: int, b: int, mm_itemsize: int, budget: int) -> int:
    if d % 128 != 0:
        return d                      # single full-width block (valid BlockSpec)
    for t in (1024, 512, 256, 128):   # 1024 only when the budget allows (v6e)
        if d % t == 0 and (t == 128 or _vmem_estimate(b, t, mm_itemsize) <= budget):
            return t
    return 128


def _normalize(z, batch: int, scale_extra: float, out_dtype):
    """Two-pass per-feature normalization (mean, unbiased std ddof=1)."""
    z = z.astype(jnp.float32)
    mean = jnp.mean(z, axis=0, keepdims=True)
    zc = z - mean
    var = jnp.sum(zc * zc, axis=0, keepdims=True) / (batch - 1)
    return (zc * (lax.rsqrt(var) * scale_extra)).astype(out_dtype)


def cross_correlation_matrix_loss(z1, z2, lmbda: float, *,
                                  feature_tile: int | None = None,
                                  matmul_dtype=None):
    """Pallas TPU implementation of CrossCorrelationMatrixLoss.forward."""
    assert z1.shape == z2.shape and z1.ndim == 2
    b, d = z1.shape
    assert b >= 2, "unbiased std (ddof=1) needs batch >= 2"

    if matmul_dtype is None:
        # bf16-native MXU for large D; exact f32 path for small problems.
        matmul_dtype = jnp.bfloat16 if d >= 1024 else jnp.float32
    mm_itemsize = jnp.dtype(matmul_dtype).itemsize

    cap = _vmem_cap_bytes()
    if feature_tile is None:
        feature_tile = _pick_feature_tile(d, b, mm_itemsize, (cap * 3) // 4)
    assert d % feature_tile == 0
    assert feature_tile == d or feature_tile % 128 == 0
    nt = d // feature_tile

    # Pre-normalize once (O(B*D) XLA prepass); 1/B of the cc matrix is folded
    # into n1 so the D x D tiles need no further scaling in the kernel.
    n1 = _normalize(z1, b, 1.0 / b, matmul_dtype)
    n2 = _normalize(z2, b, 1.0, matmul_dtype)

    est = _vmem_estimate(b, feature_tile, mm_itemsize)
    vmem_limit = min(max(int(1.5 * est), 8 << 20), cap)

    partials = pl.pallas_call(
        _make_cc_loss_kernel(float(lmbda)),
        out_shape=jax.ShapeDtypeStruct((nt * 8, feature_tile), jnp.float32),
        grid_spec=pltpu.PrefetchScalarGridSpec(
            num_scalar_prefetch=0,
            grid=(nt, nt),
            in_specs=[
                pl.BlockSpec((b, feature_tile), lambda i, j: (0, i)),
                pl.BlockSpec((b, feature_tile), lambda i, j: (0, j)),
            ],
            out_specs=pl.BlockSpec((8, feature_tile), lambda i, j: (i, 0)),
            scratch_shapes=[
                pltpu.VMEM((8, feature_tile), jnp.float32),  # sum(cc^2) partials
                pltpu.VMEM((8, feature_tile), jnp.float32),  # diag correction
            ],
        ),
        compiler_params=pltpu.CompilerParams(
            dimension_semantics=("parallel", "arbitrary"),
            vmem_limit_bytes=int(vmem_limit),
        ),
    )(n1, n2)

    # loss = lmbda * sum_all cc^2 + sum_diag[(1-d)^2 - lmbda d^2]; the kernel
    # already folded lmbda into the per-row partials, so just sum them.
    return jnp.sum(partials)


def _reference(z1, z2, lmbda):
    # Pure-JAX reference mirroring the PyTorch semantics (unbiased std).
    z1 = z1.astype(jnp.float32)
    z2 = z2.astype(jnp.float32)
    b, d = z1.shape
    n1 = (z1 - z1.mean(0)) / jnp.std(z1, axis=0, ddof=1)
    n2 = (z2 - z2.mean(0)) / jnp.std(z2, axis=0, ddof=1)
    cc = jnp.einsum("bi,bj->ij", n1, n2) / b
    diag = jnp.diagonal(cc)
    inv = jnp.sum((1.0 - diag) ** 2)
    cc_off = cc * (1.0 - jnp.eye(d, dtype=cc.dtype))
    red = jnp.sum(cc_off ** 2)
    return inv + lmbda * red


if __name__ == "__main__":
    key = jax.random.PRNGKey(0)
    k1, k2 = jax.random.split(key)
    batch, dim = 16, 256
    lmbda = 5e-3

    z1 = jax.random.normal(k1, (batch, dim), dtype=jnp.float32)
    z2 = jax.random.normal(k2, (batch, dim), dtype=jnp.float32)

    ref = jax.block_until_ready(_reference(z1, z2, lmbda))

    # f32 MXU path, 2x2 grid of 128-wide tiles: exercises the off-diagonal
    # fast path, per-row partial outputs and the megacore-parallel row axis.
    loss = jax.block_until_ready(
        cross_correlation_matrix_loss(z1, z2, lmbda, feature_tile=128,
                                      matmul_dtype=jnp.float32))
    assert jnp.allclose(loss, ref, rtol=1e-4, atol=1e-4), (loss, ref)

    # Auto-tiled default path (single 256-wide tile at this size).
    loss_auto = jax.block_until_ready(
        cross_correlation_matrix_loss(z1, z2, lmbda))
    assert jnp.allclose(loss_auto, ref, rtol=1e-4, atol=1e-4), (loss_auto, ref)

    # bf16 MXU path (default for large D on v5e/v6e/v7x): looser check.
    loss_bf16 = jax.block_until_ready(
        cross_correlation_matrix_loss(z1, z2, lmbda, feature_tile=128,
                                      matmul_dtype=jnp.bfloat16))
    assert jnp.allclose(loss_bf16, ref, rtol=5e-2, atol=5e-1), (loss_bf16, ref)

    print("KERNEL_OK")
</pallas_src>

<mosaic_0001>
module attributes {stable_mosaic.version = 11 : i64} {
  func.func @kernel(%arg0: i32, %arg1: i32, %arg2: memref<16x128xf32, #tpu.memory_space<vmem>>, %arg3: memref<16x128xf32, #tpu.memory_space<vmem>>, %arg4: memref<8x128xf32, #tpu.memory_space<vmem>>, %arg5: memref<8x128xf32, #tpu.memory_space<vmem>>, %arg6: memref<8x128xf32, #tpu.memory_space<vmem>>) attributes {dimension_semantics = [#tpu.dimension_semantics<parallel>, #tpu.dimension_semantics<arbitrary>], iteration_bounds = array<i64: 2, 2>, scalar_prefetch = 0 : i64, scratch_operands = 2 : i64, tpu.core_type = #tpu.core_type<tc>, window_params = [{transform_indices = @transform_0, window_bounds = array<i64: 16, 128>}, {transform_indices = @transform_1, window_bounds = array<i64: 16, 128>}, {transform_indices = @transform_2, window_bounds = array<i64: 8, 128>}]} {
    %c0_i32 = arith.constant 0 : i32
    %0 = arith.cmpi eq, %arg1, %c0_i32 : i32
    %1 = arith.extui %0 : i1 to i32
    %c0_i32_0 = arith.constant 0 : i32
    %2 = arith.cmpi ne, %1, %c0_i32_0 : i32
    scf.if %2 {
      %cst_10 = arith.constant 0.000000e+00 : f32
      %47 = vector.broadcast %cst_10 : f32 to vector<8x128xf32>
      %c0_11 = arith.constant 0 : index
      %c0_12 = arith.constant 0 : index
      %48 = vector.load %arg5[%c0_11, %c0_12] : memref<8x128xf32, #tpu.memory_space<vmem>>, vector<8x128xf32>
      tpu.vector_store %arg5[%c0_11, %c0_12], %47 {strides = array<i32>} : memref<8x128xf32, #tpu.memory_space<vmem>>, vector<8x128xf32>,
      %cst_13 = arith.constant 0.000000e+00 : f32
      %49 = vector.broadcast %cst_13 : f32 to vector<8x128xf32>
      %c0_14 = arith.constant 0 : index
      %c0_15 = arith.constant 0 : index
      %50 = vector.load %arg6[%c0_14, %c0_15] : memref<8x128xf32, #tpu.memory_space<vmem>>, vector<8x128xf32>
      tpu.vector_store %arg6[%c0_14, %c0_15], %49 {strides = array<i32>} : memref<8x128xf32, #tpu.memory_space<vmem>>, vector<8x128xf32>,
    } else {
    }
    %c0 = arith.constant 0 : index
    %c0_1 = arith.constant 0 : index
    %3 = vector.load %arg2[%c0, %c0_1] : memref<16x128xf32, #tpu.memory_space<vmem>>, vector<16x128xf32>
    %c0_2 = arith.constant 0 : index
    %c0_3 = arith.constant 0 : index
    %4 = vector.load %arg3[%c0_2, %c0_3] : memref<16x128xf32, #tpu.memory_space<vmem>>, vector<16x128xf32>
    %cst = arith.constant dense<0.000000e+00> : vector<128x128xf32>
    %5 = tpu.matmul %3, %4, %cst {dimension_numbers = #tpu.dot_dimension_numbers<[0], [0], [1], [1], [0, 1, 1, 1], [], []>} : vector<16x128xf32>, vector<16x128xf32>, vector<128x128xf32> -> vector<128x128xf32>
    %6 = arith.mulf %5, %5 : vector<128x128xf32>
    %c0_4 = arith.constant 0 : index
    %c0_5 = arith.constant 0 : index
    %7 = vector.load %arg5[%c0_4, %c0_5] : memref<8x128xf32, #tpu.memory_space<vmem>>, vector<8x128xf32>
    %8 = vector.extract_strided_slice %6 {offsets = [0, 0], sizes = [8, 128], strides = [1, 1]} : vector<128x128xf32> to vector<8x128xf32>
    %9 = vector.extract_strided_slice %6 {offsets = [8, 0], sizes = [8, 128], strides = [1, 1]} : vector<128x128xf32> to vector<8x128xf32>
    %10 = vector.extract_strided_slice %6 {offsets = [16, 0], sizes = [8, 128], strides = [1, 1]} : vector<128x128xf32> to vector<8x128xf32>
    %11 = vector.extract_strided_slice %6 {offsets = [24, 0], sizes = [8, 128], strides = [1, 1]} : vector<128x128xf32> to vector<8x128xf32>
    %12 = vector.extract_strided_slice %6 {offsets = [32, 0], sizes = [8, 128], strides = [1, 1]} : vector<128x128xf32> to vector<8x128xf32>
    %13 = vector.extract_strided_slice %6 {offsets = [40, 0], sizes = [8, 128], strides = [1, 1]} : vector<128x128xf32> to vector<8x128xf32>
    %14 = vector.extract_strided_slice %6 {offsets = [48, 0], sizes = [8, 128], strides = [1, 1]} : vector<128x128xf32> to vector<8x128xf32>
    %15 = vector.extract_strided_slice %6 {offsets = [56, 0], sizes = [8, 128], strides = [1, 1]} : vector<128x128xf32> to vector<8x128xf32>
    %16 = vector.extract_strided_slice %6 {offsets = [64, 0], sizes = [8, 128], strides = [1, 1]} : vector<128x128xf32> to vector<8x128xf32>
    %17 = vector.extract_strided_slice %6 {offsets = [72, 0], sizes = [8, 128], strides = [1, 1]} : vector<128x128xf32> to vector<8x128xf32>
    %18 = vector.extract_strided_slice %6 {offsets = [80, 0], sizes = [8, 128], strides = [1, 1]} : vector<128x128xf32> to vector<8x128xf32>
    %19 = vector.extract_strided_slice %6 {offsets = [88, 0], sizes = [8, 128], strides = [1, 1]} : vector<128x128xf32> to vector<8x128xf32>
    %20 = vector.extract_strided_slice %6 {offsets = [96, 0], sizes = [8, 128], strides = [1, 1]} : vector<128x128xf32> to vector<8x128xf32>
    %21 = vector.extract_strided_slice %6 {offsets = [104, 0], sizes = [8, 128], strides = [1, 1]} : vector<128x128xf32> to vector<8x128xf32>
    %22 = vector.extract_strided_slice %6 {offsets = [112, 0], sizes = [8, 128], strides = [1, 1]} : vector<128x128xf32> to vector<8x128xf32>
    %23 = vector.extract_strided_slice %6 {offsets = [120, 0], sizes = [8, 128], strides = [1, 1]} : vector<128x128xf32> to vector<8x128xf32>
    %24 = arith.addf %8, %9 : vector<8x128xf32>
    %25 = arith.addf %10, %11 : vector<8x128xf32>
    %26 = arith.addf %12, %13 : vector<8x128xf32>
    %27 = arith.addf %14, %15 : vector<8x128xf32>
    %28 = arith.addf %16, %17 : vector<8x128xf32>
    %29 = arith.addf %18, %19 : vector<8x128xf32>
    %30 = arith.addf %20, %21 : vector<8x128xf32>
    %31 = arith.addf %22, %23 : vector<8x128xf32>
    %32 = arith.addf %24, %25 : vector<8x128xf32>
    %33 = arith.addf %26, %27 : vector<8x128xf32>
    %34 = arith.addf %28, %29 : vector<8x128xf32>
    %35 = arith.addf %30, %31 : vector<8x128xf32>
    %36 = arith.addf %32, %33 : vector<8x128xf32>
    %37 = arith.addf %34, %35 : vector<8x128xf32>
    %38 = arith.addf %36, %37 : vector<8x128xf32>
    %39 = arith.addf %7, %38 : vector<8x128xf32>
    %c0_6 = arith.constant 0 : index
    %c0_7 = arith.constant 0 : index
    %40 = vector.load %arg5[%c0_6, %c0_7] : memref<8x128xf32, #tpu.memory_space<vmem>>, vector<8x128xf32>
    tpu.vector_store %arg5[%c0_6, %c0_7], %39 {strides = array<i32>} : memref<8x128xf32, #tpu.memory_space<vmem>>, vector<8x128xf32>,
    %41 = arith.cmpi eq, %arg0, %arg1 : i32
    %42 = arith.extui %41 : i1 to i32
    %c0_i32_8 = arith.constant 0 : i32
    %43 = arith.cmpi ne, %42, %c0_i32_8 : i32
    scf.if %43 {
      %47 = tpu.iota {dimensions = array<i32: 0>} : vector<128x128xi32>
      %48 = tpu.iota {dimensions = array<i32: 1>} : vector<128x128xi32>
      %49 = arith.cmpi eq, %47, %48 : vector<128x128xi32>
      %cst_10 = arith.constant 1.000000e+00 : f32
      %50 = vector.broadcast %cst_10 : f32 to vector<128x128xf32>
      %51 = arith.subf %50, %5 : vector<128x128xf32>
      %52 = arith.mulf %51, %51 : vector<128x128xf32>
      %53 = arith.mulf %5, %5 : vector<128x128xf32>
      %cst_11 = arith.constant 5.000000e-03 : f32
      %54 = vector.broadcast %cst_11 : f32 to vector<128x128xf32>
      %55 = arith.mulf %54, %53 : vector<128x128xf32>
      %56 = arith.subf %52, %55 : vector<128x128xf32>
      %cst_12 = arith.constant 0.000000e+00 : f32
      %57 = vector.broadcast %cst_12 : f32 to vector<128x128xf32>
      %58 = arith.select %49, %56, %57 : vector<128x128xi1>, vector<128x128xf32>
      %c0_13 = arith.constant 0 : index
      %c0_14 = arith.constant 0 : index
      %59 = vector.load %arg6[%c0_13, %c0_14] : memref<8x128xf32, #tpu.memory_space<vmem>>, vector<8x128xf32>
      %60 = vector.extract_strided_slice %58 {offsets = [0, 0], sizes = [8, 128], strides = [1, 1]} : vector<128x128xf32> to vector<8x128xf32>
      %61 = vector.extract_strided_slice %58 {offsets = [8, 0], sizes = [8, 128], strides = [1, 1]} : vector<128x128xf32> to vector<8x128xf32>
      %62 = vector.extract_strided_slice %58 {offsets = [16, 0], sizes = [8, 128], strides = [1, 1]} : vector<128x128xf32> to vector<8x128xf32>
      %63 = vector.extract_strided_slice %58 {offsets = [24, 0], sizes = [8, 128], strides = [1, 1]} : vector<128x128xf32> to vector<8x128xf32>
      %64 = vector.extract_strided_slice %58 {offsets = [32, 0], sizes = [8, 128], strides = [1, 1]} : vector<128x128xf32> to vector<8x128xf32>
      %65 = vector.extract_strided_slice %58 {offsets = [40, 0], sizes = [8, 128], strides = [1, 1]} : vector<128x128xf32> to vector<8x128xf32>
      %66 = vector.extract_strided_slice %58 {offsets = [48, 0], sizes = [8, 128], strides = [1, 1]} : vector<128x128xf32> to vector<8x128xf32>
      %67 = vector.extract_strided_slice %58 {offsets = [56, 0], sizes = [8, 128], strides = [1, 1]} : vector<128x128xf32> to vector<8x128xf32>
      %68 = vector.extract_strided_slice %58 {offsets = [64, 0], sizes = [8, 128], strides = [1, 1]} : vector<128x128xf32> to vector<8x128xf32>
      %69 = vector.extract_strided_slice %58 {offsets = [72, 0], sizes = [8, 128], strides = [1, 1]} : vector<128x128xf32> to vector<8x128xf32>
      %70 = vector.extract_strided_slice %58 {offsets = [80, 0], sizes = [8, 128], strides = [1, 1]} : vector<128x128xf32> to vector<8x128xf32>
      %71 = vector.extract_strided_slice %58 {offsets = [88, 0], sizes = [8, 128], strides = [1, 1]} : vector<128x128xf32> to vector<8x128xf32>
      %72 = vector.extract_strided_slice %58 {offsets = [96, 0], sizes = [8, 128], strides = [1, 1]} : vector<128x128xf32> to vector<8x128xf32>
      %73 = vector.extract_strided_slice %58 {offsets = [104, 0], sizes = [8, 128], strides = [1, 1]} : vector<128x128xf32> to vector<8x128xf32>
      %74 = vector.extract_strided_slice %58 {offsets = [112, 0], sizes = [8, 128], strides = [1, 1]} : vector<128x128xf32> to vector<8x128xf32>
      %75 = vector.extract_strided_slice %58 {offsets = [120, 0], sizes = [8, 128], strides = [1, 1]} : vector<128x128xf32> to vector<8x128xf32>
      %76 = arith.addf %60, %61 : vector<8x128xf32>
      %77 = arith.addf %62, %63 : vector<8x128xf32>
      %78 = arith.addf %64, %65 : vector<8x128xf32>
      %79 = arith.addf %66, %67 : vector<8x128xf32>
      %80 = arith.addf %68, %69 : vector<8x128xf32>
      %81 = arith.addf %70, %71 : vector<8x128xf32>
      %82 = arith.addf %72, %73 : vector<8x128xf32>
      %83 = arith.addf %74, %75 : vector<8x128xf32>
      %84 = arith.addf %76, %77 : vector<8x128xf32>
      %85 = arith.addf %78, %79 : vector<8x128xf32>
      %86 = arith.addf %80, %81 : vector<8x128xf32>
      %87 = arith.addf %82, %83 : vector<8x128xf32>
      %88 = arith.addf %84, %85 : vector<8x128xf32>
      %89 = arith.addf %86, %87 : vector<8x128xf32>
      %90 = arith.addf %88, %89 : vector<8x128xf32>
      %91 = arith.addf %59, %90 : vector<8x128xf32>
      %c0_15 = arith.constant 0 : index
      %c0_16 = arith.constant 0 : index
      %92 = vector.load %arg6[%c0_15, %c0_16] : memref<8x128xf32, #tpu.memory_space<vmem>>, vector<8x128xf32>
      tpu.vector_store %arg6[%c0_15, %c0_16], %91 {strides = array<i32>} : memref<8x128xf32, #tpu.memory_space<vmem>>, vector<8x128xf32>,
    } else {
    }
    %c1_i32 = arith.constant 1 : i32
    %44 = arith.cmpi eq, %arg1, %c1_i32 : i32
    %45 = arith.extui %44 : i1 to i32
    %c0_i32_9 = arith.constant 0 : i32
    %46 = arith.cmpi ne, %45, %c0_i32_9 : i32
    scf.if %46 {
      %c0_10 = arith.constant 0 : index
      %c0_11 = arith.constant 0 : index
      %47 = vector.load %arg5[%c0_10, %c0_11] : memref<8x128xf32, #tpu.memory_space<vmem>>, vector<8x128xf32>
      %cst_12 = arith.constant 5.000000e-03 : f32
      %48 = vector.broadcast %cst_12 : f32 to vector<8x128xf32>
      %49 = arith.mulf %48, %47 : vector<8x128xf32>
      %c0_13 = arith.constant 0 : index
      %c0_14 = arith.constant 0 : index
      %50 = vector.load %arg6[%c0_13, %c0_14] : memref<8x128xf32, #tpu.memory_space<vmem>>, vector<8x128xf32>
      %51 = arith.addf %49, %50 : vector<8x128xf32>
      %c0_15 = arith.constant 0 : index
      %c0_16 = arith.constant 0 : index
      %52 = vector.load %arg4[%c0_15, %c0_16] : memref<8x128xf32, #tpu.memory_space<vmem>>, vector<8x128xf32>
      tpu.vector_store %arg4[%c0_15, %c0_16], %51 {strides = array<i32>} : memref<8x128xf32, #tpu.memory_space<vmem>>, vector<8x128xf32>,
    } else {
    }
    return
  }
  func.func @transform_0(%arg0: i32, %arg1: i32) -> (i32, i32) {
    %c0_i32 = arith.constant 0 : i32
    %c0_i32_0 = arith.constant 0 : i32
    return %c0_i32, %arg0 : i32, i32
  }
  func.func @transform_1(%arg0: i32, %arg1: i32) -> (i32, i32) {
    %c0_i32 = arith.constant 0 : i32
    %c0_i32_0 = arith.constant 0 : i32
    return %c0_i32, %arg1 : i32, i32
  }
  func.func @transform_2(%arg0: i32, %arg1: i32) -> (i32, i32) {
    %c0_i32 = arith.constant 0 : i32
    %c0_i32_0 = arith.constant 0 : i32
    return %arg0, %c0_i32 : i32, i32
  }
}

</mosaic_0001>

<bundles_post_ra>
// kernel: tpu_custom_call.1
= control target key start
LH: loop header
LB: loop body
LE: loop exit
PB: predicated region body
PF: predicated region fallthrough
CT: control target
= control target key end

     0   :  { %s1773_s0 = inlined_call_operand.hbm [shape: f32[16,256], index: 0, kind: input, shape index: {}]   ;;  %s1774_s1 = inlined_call_operand.hbm [shape: f32[16,256], index: 1, kind: input, shape index: {}]   ;;  %s1775_s2 = inlined_call_operand.hbm [shape: f32[16,128], index: 2, kind: output, shape index: {}]  }
   0x1   :  { %1786 = sst [smem:[#allocation15_spill]] %s1773_s0 }
   0x2   :  { %7 = vsyncpa [#allocation5], 0 }
   0x3   :  { %9 = vsyncpa [#allocation5 + $0x1], 0 }
   0x4   :  { %10 = vsyncpa [#allocation8], 0 }
   0x5   :  { %12 = vsyncpa [#allocation8 + $0x1], 0 }
   0x6   :  { %13 = vsyncpa [#allocation6], 0 }
   0x7   :  { %15 = vsyncpa [#allocation6 + $0x1], 0  ;;  %s1155_s9 = smov 0   ;;  %s1157_s10 = smov 0  }
   0x8   :  { %s1159_s11 = smov 0   ;;  %s1161_s12 = smov 0  }
   0x9   :  { %s1163_s13 = smov 0   ;;  %s1165_s14 = smov 0  }
   0xa   :  { %s1167_s15 = smov 0   ;;  %s1169_s16 = smov 0  }
   0xb   :  { %s1171_s17 = smov 0   ;;  %s1173_s18 = smov 0  }
   0xc   :  { %s1175_s19 = smov 0  }
   0xd LB: > { %s746_s20 = sadd.s32 4294967295, %s1131_s19   ;;  %s747_s21 = sadd.s32 4294967294, %s1131_s19   ;;  %s1131_s19 = sphi %s1175_s19, %s21_s19   ;;  %s1127_s18 = sphi %s1173_s18, %s1821_s18   ;;  %s1123_s17 = sphi %s1171_s17, %s1820_s17   ;;  %s1119_s16 = sphi %s1169_s16, %s1819_s16   ;;  %s1115_s15 = sphi %s1167_s15, %s1818_s15   ;;  %s1111_s14 = sphi %s1165_s14, %s1817_s14   ;;  %s1107_s13 = sphi %s1163_s13, %s1816_s13   ;;  %s1103_s12 = sphi %s1161_s12, %s1815_s12   ;;  %s1099_s11 = sphi %s1159_s11, %s1814_s11   ;;  %s1095_s10 = sphi %s1157_s10, %s1813_s10   ;;  %s1091_s9 = sphi %s1155_s9, %s1812_s9  }
   0xe   : > { %s33_s22 = sadd.s32 1, %s1127_s18  ;;  %p47_p0 = scmp.ne.s32.totalorder %s1111_s14, %s1107_s13 }
   0xf   : > { %p1777_p1 = scmp.eq.s32.totalorder %s1131_s19, 0  ;;  %p53_p2 = scmp.ne.s32.totalorder %s1107_s13, %s1103_s12 }
  0x10   : > { %p1218_p3 = scmp.eq.s32.totalorder %s746_s20, 0  ;;  %p103_p5 = scmp.eq.s32.totalorder %s746_s20, 3 }
  0x11   : > { %p1224_p4 = por %p1777_p1, %p47_p0  ;;  %p109_p7 = scmp.eq.s32.totalorder %s747_s21, 3 }
  0x12   : > { %p1230_p6 = por %p1218_p3, %p53_p2  ;;  %p1234_p8 = por %p103_p5, %p47_p0 }
  0x13   : > { %p1238_p9 = por %p109_p7, %p53_p2  ;;  %p1776_p10 = scmp.lt.s32.totalorder %s1131_s19, 4 }
  0x14   : > { %s1789_s25 = scalar_select %p1230_p6, 1, 0 }
  0x15   : > { %s1790_s26 = scalar_select %p1234_p8, 1, 0 }
  0x16   : > { %s1791_s27 = scalar_select %p1238_p9, 1, 0 }
  0x17   : > { %s129_s28 = sand.u32 1, %s1111_s14   ;;  %s751_s29 = sshll.u32 %s1127_s18, 7 }
  0x18   : > { %1792 = sst [smem:[#allocation13_spill]] %s1791_s27  ;;  %s750_s30 = sshll.u32 %s129_s28, 4 }
  0x19   : > { %s1793_s0 = sld [smem:[#allocation15_spill]]  ;;  %s133_s6 = scalar_lea.vmem [#allocation4], %s750_s30 }
  0x1a   : > { %s139_s7 = sshll.u32 %s133_s6, 4  ;;  %p1254_p11 = pnand %p1776_p10, %p1224_p4  ;;  %s1258_s7 = int_to_ptr.vmem [resolvable:$true] %s139_s7 }
  0x1b   : > { %s1261_s20 = scalar_lea.sflag [#allocation5], %s129_s28 }
  0x1c   : > { %p947_p0 = pneg %p1254_p11 }
  0x1f   : > { %s1248_s5 = scalar_lea.hbm %s1793_s0, %s751_s29  ;;  %s950_s30 = scalar_lea.hbm %s1793_s0, 512 }
  0x20   : > { %s945_s21 = scalar_lea.hbm %s1248_s5, 256  ;;  %p951_p4 = scmp.lt.u32.totalorder %s1248_s5, %s1793_s0 }
  0x21   : > { %p946_p13 = scmp.ne.s32.totalorder %s1248_s5, %s945_s21  ;;  %p952_p7 = scmp.lt.u32.totalorder %s950_s30, %s945_s21 }
  0x22   : > { %p954_p1 = scmp.lt.u32.totalorder %s945_s21, %s1248_s5 }
  0x23   : > { %p948_p2 = pnand %p947_p0, %p946_p13  ;;  %p953_p10 = por %p952_p7, %p951_p4 }
  0x25   : > { %p949_p5 = pneg %p948_p2  ;;  %p955_p12 = por %p954_p1, %p953_p10 }
  0x27   : > { %p956_p9 = pnand %p955_p12, %p949_p5 }
  0x29   : > { %959 = shalt.err (!%p956_p9)
}
  0x2a   : > { %s960_s28 = scalar_lea.vmem %s1258_s7, 256  ;;  %s1133_s6 = smov [#allocation4]  }
  0x2b   : > { %p961_p13 = scmp.ne.s32.totalorder %s1258_s7, %s960_s28  ;;  %s965_s24 = sshll.u32 %s1133_s6, 4  ;;  %s966_s24 = int_to_ptr.vmem [resolvable:$false] %s965_s24 }
  0x2c   : > { %s967_s29 = scalar_lea.vmem %s966_s24, 512  ;;  %p968_p6 = scmp.lt.s32.totalorder %s1258_s7, %s966_s24 }
  0x2d   : > { %p963_p2 = pnand %p961_p13, %p947_p0  ;;  %p969_p4 = scmp.lt.s32.totalorder %s967_s29, %s960_s28 }
  0x2f   : > { %p964_p8 = pneg %p963_p2  ;;  %p970_p7 = por %p969_p4, %p968_p6 }
  0x31   : > { %p971_p1 = pnand %p970_p7, %p964_p8 }
  0x33   : > { %974 = shalt.err (!%p971_p1)
}
  0x34   : > { %s1780_s21 = smov 256   ;;  %s1781_s30 = smov 128  }
  0x35   : > { %s1782_s3 = smov 8   ;;  %p167_p6 = scmp.lt.s32.totalorder %s1131_s19, 5 }
  0x36   : > { %842 = dma.hbm_to_vmem [thread:$0]  (!%p1254_p11), %s1248_s5, 256, %s1258_s7, %s1261_s20, %s1780_s21, %s1781_s30, %s1782_s3  }
  0x37   : > { %p1795_p8 = scmp.ge.s32.totalorder %s1131_s19, 1  ;;  %s40_s28 = sadd.s32 1, %s1111_s14 }
  0x38   : > { %s30_s6 = sadd.s32 1, %s1123_s17  ;;  %s66_s24 = sadd.s32 1, %s1099_s11 }
  0x39   : > { %p1295_p9 = pnand %p1795_p8, %p167_p6  ;;  %p31_p10 = scmp.ge.s32.totalorder %s30_s6, 2 }
  0x3a   : > { %p73_p12 = scmp.ne.s32.totalorder %s1099_s11, %s1095_s10  ;;  %p79_p0 = scmp.ne.s32.totalorder %s1095_s10, %s1091_s9 }
  0x3b   : > { %s1823_s6 = smov (%p31_p10, %s30_s6), 0  ;;  %s1825_s22 = smov (!%p31_p10, %s33_s22), %s1127_s18 }
  0x3c   : > { %1797 = sst [smem:[#allocation14_spill]] %s1823_s6  ;;  %s63_s5 = ssub.s32 %s1123_s17, %s1823_s6 }
  0x3d   : > { %s149_s7 = sand.u32 1, %s1099_s11   ;;  %p35_p11 = scmp.ge.s32.totalorder %s1825_s22, 2 }
  0x3e   : > { %p64_p5 = scmp.eq.s32.totalorder %s63_s5, 0  ;;  %p1798_p13 = scmp.eq.s32.totalorder %s1131_s19, 0 }
  0x3f   : > { %p1322_p4 = por %p79_p0, %p1218_p3  ;;  %s1827_s22 = smov (%p35_p11, %s1825_s22), 0 }
  0x40   : > { %p1316_p2 = por %p73_p12, %p1798_p13  ;;  %s37_s29 = ssub.s32 %s1127_s18, %s1827_s22 }
  0x41   : > { %s1800_s9 = scalar_select %p1322_p4, 1, 0 }
  0x42   : > { %s1329_s20 = scalar_select %p64_p5, %s1099_s11, %s66_s24  }
  0x43   : > { %s752_s21 = sshll.u32 %s149_s7, 4  ;;  %p38_p7 = scmp.eq.s32.totalorder %s37_s29, 0 }
  0x44   : > { %s753_s5 = sshll.u32 %s1123_s17, 7  ;;  %s153_s30 = scalar_lea.vmem [#allocation7], %s752_s21 }
  0x45   : > { %s159_s3 = sshll.u32 %s153_s30, 4  ;;  %s1340_s27 = scalar_lea.hbm %s1774_s1, %s753_s5  ;;  %s1342_s3 = int_to_ptr.vmem [resolvable:$true] %s159_s3 }
  0x46   : > { %s1335_s0 = scalar_select %p38_p7, %s1111_s14, %s40_s28  }
  0x47   : > { %p1801_p3 = scmp.lt.s32.totalorder %s1131_s19, 4  ;;  %s1352_s21 = scalar_lea.sflag [#allocation8], %s149_s7 }
  0x48   : > { %s975_s30 = scalar_lea.hbm %s1340_s27, 256  ;;  %s980_s8 = scalar_lea.hbm %s1774_s1, 512 }
  0x49   : > { %p1348_p1 = pnand %p1801_p3, %p1316_p2  ;;  %p976_p6 = scmp.ne.s32.totalorder %s1340_s27, %s975_s30 }
  0x4a   : > { %p981_p0 = scmp.lt.u32.totalorder %s1340_s27, %s1774_s1  ;;  %p982_p11 = scmp.lt.u32.totalorder %s980_s8, %s975_s30 }
  0x4b   : > { %p977_p8 = pneg %p1348_p1  ;;  %p984_p13 = scmp.lt.u32.totalorder %s975_s30, %s1340_s27 }
  0x4c   : > { %p983_p5 = por %p982_p11, %p981_p0 }
  0x4d   : > { %p978_p10 = pnand %p977_p8, %p976_p6 }
  0x4e   : > { %p985_p2 = por %p984_p13, %p983_p5 }
  0x4f   : > { %p979_p12 = pneg %p978_p10 }
  0x51   : > { %p986_p7 = pnand %p985_p2, %p979_p12 }
  0x53   : > { %989 = shalt.err (!%p986_p7)
}
  0x54   : > { %s990_s7 = scalar_lea.vmem %s1342_s3, 256  ;;  %s1137_s23 = smov [#allocation7]  }
  0x55   : > { %p991_p3 = scmp.ne.s32.totalorder %s1342_s3, %s990_s7  ;;  %s995_s28 = sshll.u32 %s1137_s23, 4  ;;  %s996_s28 = int_to_ptr.vmem [resolvable:$false] %s995_s28 }
  0x56   : > { %s997_s6 = scalar_lea.vmem %s996_s28, 512  ;;  %p998_p4 = scmp.lt.s32.totalorder %s1342_s3, %s996_s28 }
  0x57   : > { %p993_p6 = pnand %p991_p3, %p977_p8  ;;  %p999_p0 = scmp.lt.s32.totalorder %s997_s6, %s990_s7 }
  0x59   : > { %p994_p10 = pneg %p993_p6  ;;  %p1000_p11 = por %p999_p0, %p998_p4 }
  0x5b   : > { %p1001_p5 = pnand %p1000_p11, %p994_p10 }
  0x5d   : > { %1004 = shalt.err (!%p1001_p5)
}
  0x5e   : > { %s1803_s30 = smov 8   ;;  %s1804_s8 = smov 128  }
  0x5f   : > { %s1805_s29 = smov 256   ;;  %171 = sbr.rel (%p1295_p9) target bundleno = 585 (0x249), region = 28 }
  0x60   : > { %845 = dma.hbm_to_vmem [thread:$0]  (!%p1348_p1), %s1340_s27, 256, %s1342_s3, %s1352_s21, %s1805_s29, %s1804_s8, %s1803_s30  }
  0x61   : > { %s1386_s5 = sand.u32 (!%p1295_p9), 1, %s1107_s13   ;;  %p1806_p4 = scmp.ne.s32.totalorder (!%p1295_p9), %s1789_s25, 0 }
  0x62   : > { %s755_s7 = sshll.u32 (!%p1295_p9), %s1386_s5, 4  ;;  %s174_s23 = scalar_lea.sflag (!%p1295_p9), [#allocation5], %s1386_s5 }
  0x63   : > { %s177_s28 = scalar_lea.vmem (!%p1295_p9), [#allocation4], %s755_s7 }
  0x66   : > { %1078 = dma.done.wait (%p1806_p4), %s174_s23, 256  }
  0x67   : > { %1080 = vsyncadd (%p1806_p4), %s174_s23, 4294967040  ;;  %s182_s27 = sand.u32 1, %s1095_s10   ;;  %p1807_p9 = scmp.ne.s32.totalorder %s1800_s9, 0 }
  0x68   : > { %s756_s3 = sshll.u32 %s182_s27, 4  ;;  %s183_s4 = scalar_lea.sflag [#allocation8], %s182_s27 }
  0x69   : > { %s186_s24 = scalar_lea.vmem [#allocation7], %s756_s3 }
  0x6a   : > { %1082 = dma.done.wait (%p1807_p9), %s183_s4, 256  }
  0x6b   : > { %1084 = vsyncadd (%p1807_p9), %s183_s4, 4294967040  ;;  %s757_s21 = sshll.u32 %s1386_s5, 3  ;;  %p758_p1 = scmp.ne.s32.totalorder %s1115_s15, 0 }
  0x6c   : > { %s1400_s6 = scalar_lea.vmem [#allocation9], %s757_s21  ;;  %v1138_v0 = vmov (!%p758_p1), 0.0  }
  0x6d   : > { %215 = sbr.rel (%p758_p1) target bundleno = 116 (0x74), region = 40  ;;  %216 = vst [vmem:[#allocation2] sm:$0xff] (!%p758_p1), %v1138_v0  ;;  %217 = vst [vmem:[#allocation3] sm:$0xff] (!%p758_p1), %v1138_v0 }
  0x74 PF: > { %v218_v1 = vld [vmem:[%s177_s28] sm:$0xff]  ;;  %v221_v3 = vld [vmem:[%s186_s24 + $0x8] sm:$0xff]  ;;  %vm254_vm0 = vcmask 130048   ;;  %p775_p8 = scmp.ne.s32.totalorder %s1119_s16, %s1115_s15 }
  0x75   : > { %v220_v2 = vld [vmem:[%s186_s24] sm:$0xff]  ;;  %222 = vxpose.xlu0.b32.start [1/2] (short) %v218_v1, 128  ;;  %v219_v4 = vld [vmem:[%s177_s28 + $0x8] sm:$0xff] }
  0x76   : > { %v827_v5 = vpack.c.bf16 %v221_v3, %v220_v2 }
  0x78   : > { %828 = vmatprep.subr.bf16.mxu0 %v827_v5  ;;  %831 = vmatprep.subr.bf16.mxu1 %v827_v5 }
  0x79   : > { %223 = vxpose.xlu0.b32.end [2/2] (short) %v219_v4, 128  ;;  %830 = vmatpush3.bf16.msra.mxu0 %v827_v5  ;;  %v464_v4 = vld [vmem:[#allocation2] sm:$0xff] }
  0x7a   : > { %832 = vmatpush3.bf16.msra.mxu1 %v827_v5 }
  0xf5   : > { %v238_v6 = vpop.trf.xlu0 }
  0xf6   : > { %803 = vmatprep.mubr.msk.f32.mxu0 %vm254_vm0, %v238_v6 }
  0xf9   : > { %v239_v7 = vpop.trf.xlu0 }
  0xfa   : > { %804 = vmatmul.mubr.msk.f32.vlgmr.msra.gmra.mrb[0].mxu0 %vm254_vm0, %v239_v7  ;;  %v486_v7 = vlaneseq (!%p775_p8) }
  0xfd   : > { %v240_v8 = vpop.trf.xlu0 }
  0xfe   : > { %806 = vmatprep.mubr.msk.f32.mxu0 %vm254_vm0, %v240_v8  ;;  %v1533_v8 = vshrl.u32 (!%p775_p8), %v486_v7, 7 }
 0x101   : > { %v241_v9 = vpop.trf.xlu0 }
 0x102   : > { %807 = vmatmul.mubr.msk.f32.gmra.mrb[2].mxu0 %vm254_vm0, %v241_v9 }
 0x105   : > { %v242_v10 = vpop.trf.xlu0 }
 0x106   : > { %809 = vmatprep.mubr.msk.f32.mxu0 %vm254_vm0, %v242_v10 }
 0x109   : > { %v243_v11 = vpop.trf.xlu0 }
 0x10a   : > { %810 = vmatmul.mubr.msk.f32.gmra.mrb[4].mxu0 %vm254_vm0, %v243_v11 }
 0x10d   : > { %v244_v12 = vpop.trf.xlu0 }
 0x10e   : > { %812 = vmatprep.mubr.msk.f32.mxu0 %vm254_vm0, %v244_v12 }
 0x111   : > { %v245_v13 = vpop.trf.xlu0 }
 0x112   : > { %813 = vmatmul.mubr.msk.f32.gmra.mrb[6].mxu0 %vm254_vm0, %v245_v13 }
 0x115   : > { %v246_v14 = vpop.trf.xlu0 }
 0x116   : > { %815 = vmatprep.mubr.msk.f32.mxu1 %vm254_vm0, %v246_v14  ;;  %v1540_v14 = vand.u32 (!%p775_p8), 127, %v486_v7 }
 0x118   : > { %vm505_vm1 = vcmp.eq.s32.totalorder (!%p775_p8), %v1533_v8, %v1540_v14 }
 0x119   : > { %v247_v15 = vpop.trf.xlu0 }
 0x11a   : > { %816 = vmatmul.mubr.msk.f32.vlgmr.msra.gmra.mrb[0].mxu1 %vm254_vm0, %v247_v15 }
 0x11d   : > { %v248_v16 = vpop.trf.xlu0 }
 0x11e   : > { %818 = vmatprep.mubr.msk.f32.mxu1 %vm254_vm0, %v248_v16 }
 0x121   : > { %v249_v17 = vpop.trf.xlu0 }
 0x122   : > { %819 = vmatmul.mubr.msk.f32.gmra.mrb[2].mxu1 %vm254_vm0, %v249_v17 }
 0x125   : > { %v250_v18 = vpop.trf.xlu0 }
 0x126   : > { %821 = vmatprep.mubr.msk.f32.mxu1 %vm254_vm0, %v250_v18 }
 0x129   : > { %v251_v19 = vpop.trf.xlu0 }
 0x12a   : > { %822 = vmatmul.mubr.msk.f32.gmra.mrb[4].mxu1 %vm254_vm0, %v251_v19 }
 0x12d   : > { %v252_v20 = vpop.trf.xlu0 }
 0x12e   : > { %824 = vmatprep.mubr.msk.f32.mxu1 %vm254_vm0, %v252_v20 }
 0x131   : > { %v253_v21 = vpop.trf.xlu0 }
 0x132   : > { %825 = vmatmul.mubr.msk.f32.gmra.mrb[6].mxu1 %vm254_vm0, %v253_v21 }
 0x1cd   : > { %v1419_v22 = vpop.f32.mrb[0].mxu0 }
 0x1ce   : > { %v1423_v23 = vmul.f32 %v1419_v22, %v1419_v22  ;;  %v1425_v24 = vpop.f32.mrb[1].mxu0  ;;  %v522_v10 = vsub.f32 (!%p775_p8), 1.0, %v1419_v22  ;;  %v1550_v22 = vadd.s32 (!%p775_p8), 8, %v1533_v8 }
 0x1cf   : > { %v1429_v25 = vmul.f32 %v1425_v24, %v1425_v24  ;;  %v521_v9 = vsub.f32 (!%p775_p8), 1.0, %v1425_v24  ;;  %v1553_v24 = vadd.s32 (!%p775_p8), 16, %v1533_v8 }
 0x1d0   : > { %vm506_vm2 = vcmp.eq.s32.totalorder (!%p775_p8), %v1550_v22, %v1540_v14 }
 0x1d1   : > { %v465_v26 = vadd.f32 %v1423_v23, %v1429_v25  ;;  %vm507_vm3 = vcmp.eq.s32.totalorder (!%p775_p8), %v1553_v24, %v1540_v14 }
 0x1d5   : > { %v1433_v27 = vpop.f32.mrb[2].mxu0 }
 0x1d6   : > { %v1437_v28 = vmul.f32 %v1433_v27, %v1433_v27  ;;  %v1439_v29 = vpop.f32.mrb[3].mxu0  ;;  %v524_v12 = vsub.f32 (!%p775_p8), 1.0, %v1433_v27 }
 0x1d7   : > { %v1443_v30 = vmul.f32 %v1439_v29, %v1439_v29  ;;  %v523_v11 = vsub.f32 (!%p775_p8), 1.0, %v1439_v29  ;;  %v1560_v29 = vadd.s32 (!%p775_p8), 32, %v1533_v8 }
 0x1d9   : > { %v466_v31 = vadd.f32 %v1437_v28, %v1443_v30  ;;  %vm509_vm5 = vcmp.eq.s32.totalorder (!%p775_p8), %v1560_v29, %v1540_v14 }
 0x1db   : > { %v473_v32 = vadd.f32 %v466_v31, %v465_v26  ;;  %v1556_v26 = vadd.s32 (!%p775_p8), 24, %v1533_v8  ;;  %v1563_v31 = vadd.s32 (!%p775_p8), 40, %v1533_v8 }
 0x1dd   : > { %v1447_v33 = vpop.f32.mrb[4].mxu0  ;;  %vm508_vm4 = vcmp.eq.s32.totalorder (!%p775_p8), %v1556_v26, %v1540_v14  ;;  %vm510_vm6 = vcmp.eq.s32.totalorder (!%p775_p8), %v1563_v31, %v1540_v14 }
 0x1de   : > { %v1451_v34 = vmul.f32 %v1447_v33, %v1447_v33  ;;  %v1453_v35 = vpop.f32.mrb[5].mxu0  ;;  %v526_v15 = vsub.f32 (!%p775_p8), 1.0, %v1447_v33  ;;  %v1569_v33 = vadd.s32 (!%p775_p8), 56, %v1533_v8 }
 0x1df   : > { %v1457_v36 = vmul.f32 %v1453_v35, %v1453_v35  ;;  %v525_v13 = vsub.f32 (!%p775_p8), 1.0, %v1453_v35  ;;  %v1572_v35 = vadd.s32 (!%p775_p8), 64, %v1533_v8 }
 0x1e0   : > { %vm512_vm8 = vcmp.eq.s32.totalorder (!%p775_p8), %v1569_v33, %v1540_v14 }
 0x1e1   : > { %v467_v37 = vadd.f32 %v1451_v34, %v1457_v36  ;;  %vm513_vm9 = vcmp.eq.s32.totalorder (!%p775_p8), %v1572_v35, %v1540_v14 }
 0x1e5   : > { %v1461_v38 = vpop.f32.mrb[6].mxu0 }
 0x1e6   : > { %v1465_v39 = vmul.f32 %v1461_v38, %v1461_v38  ;;  %v1467_v40 = vpop.f32.mrb[7].mxu0  ;;  %v528_v17 = vsub.f32 (!%p775_p8), 1.0, %v1461_v38  ;;  %v1578_v38 = vadd.s32 (!%p775_p8), 80, %v1533_v8 }
 0x1e7   : > { %v1471_v41 = vmul.f32 %v1467_v40, %v1467_v40  ;;  %v527_v16 = vsub.f32 (!%p775_p8), 1.0, %v1467_v40  ;;  %v1581_v40 = vadd.s32 (!%p775_p8), 88, %v1533_v8 }
 0x1e8   : > { %vm515_vm11 = vcmp.eq.s32.totalorder (!%p775_p8), %v1578_v38, %v1540_v14 }
 0x1e9   : > { %v468_v42 = vadd.f32 %v1465_v39, %v1471_v41  ;;  %vm516_vm12 = vcmp.eq.s32.totalorder (!%p775_p8), %v1581_v40, %v1540_v14 }
 0x1eb   : > { %v474_v43 = vadd.f32 %v468_v42, %v467_v37  ;;  %v1575_v37 = vadd.s32 (!%p775_p8), 72, %v1533_v8  ;;  %v1584_v42 = vadd.s32 (!%p775_p8), 96, %v1533_v8 }
 0x1ed   : > { %v477_v44 = vadd.f32 %v474_v43, %v473_v32  ;;  %v1475_v45 = vpop.f32.mrb[0].mxu1  ;;  %v1566_v32 = vadd.s32 (!%p775_p8), 48, %v1533_v8  ;;  %v1587_v43 = vadd.s32 (!%p775_p8), 104, %v1533_v8  ;;  %vm514_vm10 = vcmp.eq.s32.totalorder (!%p775_p8), %v1575_v37, %v1540_v14 }
 0x1ee   : > { %v1479_v46 = vmul.f32 %v1475_v45, %v1475_v45  ;;  %v1481_v47 = vpop.f32.mrb[1].mxu1  ;;  %v530_v19 = vsub.f32 (!%p775_p8), 1.0, %v1475_v45  ;;  %v1593_v45 = vadd.s32 (!%p775_p8), 120, %v1533_v8  ;;  %vm517_vm13 = vcmp.eq.s32.totalorder (!%p775_p8), %v1584_v42, %v1540_v14 }
 0x1ef   : > { %v1485_v48 = vmul.f32 %v1481_v47, %v1481_v47  ;;  %v529_v18 = vsub.f32 (!%p775_p8), 1.0, %v1481_v47  ;;  %vm511_vm7 = vcmp.eq.s32.totalorder (!%p775_p8), %v1566_v32, %v1540_v14  ;;  %vm518_vm14 = vcmp.eq.s32.totalorder (!%p775_p8), %v1587_v43, %v1540_v14 }
 0x1f0   : > { %vm520_vm0 = vcmp.eq.s32.totalorder (!%p775_p8), %v1593_v45, %v1540_v14 }
 0x1f1   : > { %v469_v49 = vadd.f32 %v1479_v46, %v1485_v48 }
 0x1f5   : > { %v1489_v50 = vpop.f32.mrb[2].mxu1 }
 0x1f6   : > { %v1493_v51 = vmul.f32 %v1489_v50, %v1489_v50  ;;  %v1495_v52 = vpop.f32.mrb[3].mxu1  ;;  %v532_v21 = vsub.f32 (!%p775_p8), 1.0, %v1489_v50 }
 0x1f7   : > { %v1499_v53 = vmul.f32 %v1495_v52, %v1495_v52  ;;  %v531_v20 = vsub.f32 (!%p775_p8), 1.0, %v1495_v52  ;;  %v1598_v52 = vmul.f32 (!%p775_p8), %v521_v9, %v521_v9  ;;  %v553_v9 = vmul.f32 (!%p775_p8), 0.005, %v1429_v25 }
 0x1f8   : > { %v558_v25 = vmul.f32 (!%p775_p8), 0.005, %v1451_v34 }
 0x1f9   : > { %v470_v54 = vadd.f32 %v1493_v51, %v1499_v53 }
 0x1fb   : > { %v475_v55 = vadd.f32 %v470_v54, %v469_v49  ;;  %v1602_v54 = vmul.f32 (!%p775_p8), %v522_v10, %v522_v10  ;;  %v554_v10 = vmul.f32 (!%p775_p8), 0.005, %v1423_v23  ;;  %v559_v23 = vmul.f32 (!%p775_p8), 0.005, %v1471_v41 }
 0x1fd   : > { %v1503_v56 = vpop.f32.mrb[4].mxu1 }
 0x1fe   : > { %v1507_v57 = vmul.f32 %v1503_v56, %v1503_v56  ;;  %v1509_v58 = vpop.f32.mrb[5].mxu1  ;;  %v534_v47 = vsub.f32 (!%p775_p8), 1.0, %v1503_v56  ;;  %v542_v56 = vmul.f32 (!%p775_p8), %v526_v15, %v526_v15  ;;  %v557_v15 = vmul.f32 (!%p775_p8), 0.005, %v1457_v36 }
 0x1ff   : > { %v1513_v59 = vmul.f32 %v1509_v58, %v1509_v58  ;;  %v533_v27 = vsub.f32 (!%p775_p8), 1.0, %v1509_v58  ;;  %v1606_v58 = vmul.f32 (!%p775_p8), %v524_v12, %v524_v12  ;;  %v555_v12 = vmul.f32 (!%p775_p8), 0.005, %v1443_v30 }
 0x200   : > { %v570_v30 = vsub.f32 (!%p775_p8), %v1602_v54, %v554_v10  ;;  %v566_v34 = vmul.f32 (!%p775_p8), 0.005, %v1507_v57 }
 0x201   : > { %v471_v60 = vadd.f32 %v1507_v57, %v1513_v59  ;;  %v565_v36 = vmul.f32 (!%p775_p8), 0.005, %v1513_v59 }
 0x205   : > { %v1517_v61 = vpop.f32.mrb[6].mxu1 }
 0x206   : > { %v1521_v62 = vmul.f32 %v1517_v61, %v1517_v61  ;;  %v1523_v63 = vpop.f32.mrb[7].mxu1  ;;  %v536_v50 = vsub.f32 (!%p775_p8), 1.0, %v1517_v61  ;;  %v543_v61 = vmul.f32 (!%p775_p8), %v527_v16, %v527_v16  ;;  %v560_v16 = vmul.f32 (!%p775_p8), 0.005, %v1465_v39 }
 0x207   : > { %v1527_v0 = vmul.f32 %v1523_v63, %v1523_v63  ;;  %v535_v49 = vsub.f32 (!%p775_p8), 1.0, %v1523_v63  ;;  %v544_v63 = vmul.f32 (!%p775_p8), %v528_v17, %v528_v17  ;;  %v569_v17 = vsub.f32 (!%p775_p8), %v1598_v52, %v553_v9 }
 0x209   : > { %v472_v1 = vadd.f32 %v1521_v62, %v1527_v0  ;;  %v551_v7 = vmul.f32 (!%p775_p8), %v535_v49, %v535_v49  ;;  %v567_v39 = vmul.f32 (!%p775_p8), 0.005, %v1527_v0  ;;  %v585_v0 = vsel (!%p775_p8), %vm505_vm1, %v569_v17, 0.0 }
 0x20b   : > { %v476_v2 = vadd.f32 %v472_v1, %v471_v60  ;;  %v1608_v60 = vmul.f32 (!%p775_p8), %v525_v13, %v525_v13  ;;  %v545_v1 = vmul.f32 (!%p775_p8), %v529_v18, %v529_v18  ;;  %v556_v13 = vmul.f32 (!%p775_p8), 0.005, %v1437_v28 }
 0x20c   : > { %v561_v18 = vmul.f32 (!%p775_p8), 0.005, %v1485_v48  ;;  %v564_v28 = vmul.f32 (!%p775_p8), 0.005, %v1493_v51  ;;  %v583_v57 = vsub.f32 (!%p775_p8), %v551_v7, %v567_v39 }
 0x20d   : > { %v478_v3 = vadd.f32 %v476_v2, %v475_v55  ;;  %485 = sbr.rel (%p775_p8) target bundleno = 548 (0x224), region = 44  ;;  %v1604_v55 = vmul.f32 (!%p775_p8), %v523_v11, %v523_v11  ;;  %v546_v2 = vmul.f32 (!%p775_p8), %v530_v19, %v530_v19  ;;  %v552_v11 = vmul.f32 (!%p775_p8), %v536_v50, %v536_v50 }
 0x20e   : > { %v562_v19 = vmul.f32 (!%p775_p8), 0.005, %v1479_v46  ;;  %v572_v48 = vsub.f32 (!%p775_p8), %v1606_v58, %v556_v13  ;;  %v573_v46 = vsub.f32 (!%p775_p8), %v1608_v60, %v557_v15  ;;  %v577_v49 = vsub.f32 (!%p775_p8), %v545_v1, %v561_v18 }
 0x20f   : > { %v479_v5 = vadd.f32 %v478_v3, %v477_v44  ;;  %v1590_v44 = vadd.s32 (!%p775_p8), 112, %v1533_v8  ;;  %v547_v3 = vmul.f32 (!%p775_p8), %v531_v20, %v531_v20  ;;  %v563_v20 = vmul.f32 (!%p775_p8), 0.005, %v1499_v53 }
 0x210   : > { %v571_v41 = vsub.f32 (!%p775_p8), %v1604_v55, %v555_v12  ;;  %v575_v53 = vsub.f32 (!%p775_p8), %v543_v61, %v559_v23  ;;  %v578_v50 = vsub.f32 (!%p775_p8), %v546_v2, %v562_v19  ;;  %v588_v58 = vsel (!%p775_p8), %vm508_vm4, %v572_v48, 0.0 }
 0x211   : > { %v480_v6 = vadd.f32 %v479_v5, %v464_v4  ;;  %v548_v4 = vmul.f32 (!%p775_p8), %v532_v21, %v532_v21  ;;  %v549_v5 = vmul.f32 (!%p775_p8), %v533_v27, %v533_v27  ;;  %vm519_vm15 = vcmp.eq.s32.totalorder (!%p775_p8), %v1590_v44, %v1540_v14  ;;  %v601_v44 = vld [vmem:[#allocation3] sm:$0xff] (!%p775_p8) }
 0x212   : > { %v568_v21 = vmul.f32 (!%p775_p8), 0.005, %v1521_v62  ;;  %v574_v27 = vsub.f32 (!%p775_p8), %v542_v56, %v558_v25  ;;  %v579_v51 = vsub.f32 (!%p775_p8), %v547_v3, %v563_v20  ;;  %v586_v62 = vsel (!%p775_p8), %vm506_vm2, %v570_v30, 0.0 }
 0x213   : > { %481 = vst [vmem:[#allocation2] sm:$0xff] %v480_v6  ;;  %v550_v6 = vmul.f32 (!%p775_p8), %v534_v47, %v534_v47  ;;  %v576_v47 = vsub.f32 (!%p775_p8), %v544_v63, %v560_v16  ;;  %v580_v52 = vsub.f32 (!%p775_p8), %v548_v4, %v564_v28  ;;  %v581_v59 = vsub.f32 (!%p775_p8), %v549_v5, %v565_v36 }
 0x214   : > { %v584_v9 = vsub.f32 %v552_v11, %v568_v21  ;;  %v587_v55 = vsel %vm507_vm3, %v571_v41, 0.0  ;;  %v589_v60 = vsel %vm509_vm5, %v573_v46, 0.0  ;;  %v590_v8 = vsel %vm510_vm6, %v574_v27, 0.0 }
 0x215   : > { %v582_v54 = vsub.f32 %v550_v6, %v566_v34  ;;  %v591_v22 = vsel %vm511_vm7, %v575_v53, 0.0  ;;  %v592_v24 = vsel %vm512_vm8, %v576_v47, 0.0  ;;  %v593_v26 = vsel %vm513_vm9, %v577_v49, 0.0 }
 0x216   : > { %v594_v29 = vsel %vm514_vm10, %v578_v50, 0.0  ;;  %v595_v31 = vsel %vm515_vm11, %v579_v51, 0.0  ;;  %v596_v32 = vsel %vm516_vm12, %v580_v52, 0.0  ;;  %v597_v33 = vsel %vm517_vm13, %v581_v59, 0.0 }
 0x217   : > { %v598_v35 = vsel %vm518_vm14, %v582_v54, 0.0  ;;  %v599_v37 = vsel %vm519_vm15, %v583_v57, 0.0  ;;  %v600_v38 = vsel %vm520_vm0, %v584_v9, 0.0  ;;  %v602_v56 = vadd.f32 %v586_v62, %v585_v0 }
 0x218   : > { %v603_v61 = vadd.f32 %v588_v58, %v587_v55  ;;  %v604_v40 = vadd.f32 %v590_v8, %v589_v60  ;;  %v605_v63 = vadd.f32 %v592_v24, %v591_v22  ;;  %v606_v1 = vadd.f32 %v594_v29, %v593_v26 }
 0x219   : > { %v607_v2 = vadd.f32 %v596_v32, %v595_v31  ;;  %v608_v42 = vadd.f32 %v598_v35, %v597_v33  ;;  %v609_v3 = vadd.f32 %v600_v38, %v599_v37 }
 0x21a   : > { %v610_v4 = vadd.f32 %v603_v61, %v602_v56  ;;  %v611_v5 = vadd.f32 %v605_v63, %v604_v40 }
 0x21b   : > { %v612_v43 = vadd.f32 %v607_v2, %v606_v1  ;;  %v613_v6 = vadd.f32 %v609_v3, %v608_v42 }
 0x21c   : > { %v614_v7 = vadd.f32 %v611_v5, %v610_v4 }
 0x21d   : > { %v615_v10 = vadd.f32 %v613_v6, %v612_v43 }
 0x21f   : > { %v616_v11 = vadd.f32 %v615_v10, %v614_v7 }
 0x221   : > { %v617_v12 = vadd.f32 %v616_v11, %v601_v44 }
 0x223   : > { %618 = vst [vmem:[#allocation3] sm:$0xff] %v617_v12 }
 0x224 PF: > { %p776_p12 = scmp.ne.s32.totalorder %s1115_s15, 1 }
 0x226   : > { %622 = sbr.rel (%p776_p12) target bundleno = 560 (0x230), region = 48 }
 0x22a   : > { %v623_v14 = vld [vmem:[#allocation2] sm:$0xff] (!%p776_p12)  ;;  %v625_v45 = vld [vmem:[#allocation3] sm:$0xff] (!%p776_p12) }
 0x22b   : > { %v624_v13 = vmul.f32 (!%p776_p12), 0.005, %v623_v14 }
 0x22d   : > { %v626_v15 = vadd.f32 %v625_v45, %v624_v13 }
 0x22f   : > { %627 = vst [vmem:[%s1400_s6] sm:$0xff] %v626_v15 }
 0x230 PF: > { %s778_s25 = sshll.u32 %s1119_s16, 7  ;;  %s642_s29 = sshll.u32 %s1400_s6, 4  ;;  %s643_s29 = int_to_ptr.vmem [resolvable:$true] %s642_s29 }
 0x231   : > { %s1715_s8 = scalar_lea.hbm %s1775_s2, %s778_s25  ;;  %s629_s15 = scalar_lea.sflag [#allocation6], %s1386_s5 }
 0x232   : > { %s1005_s7 = scalar_lea.vmem %s643_s29, 128  ;;  %p1808_p2 = scmp.ne.s32.totalorder %s1790_s26, 0 }
 0x233   : > { %p1006_p13 = scmp.ne.s32.totalorder %s643_s29, %s1005_s7  ;;  %s1139_s23 = smov [#allocation9]  }
 0x234   : > { %s1009_s28 = sshll.u32 %s1139_s23, 4  ;;  %s1010_s28 = int_to_ptr.vmem [resolvable:$false] %s1009_s28 }
 0x235   : > { %p1007_p7 = pnand %p1006_p13, %p1808_p2  ;;  %s1011_s27 = scalar_lea.vmem %s1010_s28, 256 }
 0x236   : > { %p1012_p6 = scmp.lt.s32.totalorder %s643_s29, %s1010_s28  ;;  %p1013_p10 = scmp.lt.s32.totalorder %s1011_s27, %s1005_s7 }
 0x237   : > { %p1008_p3 = pneg %p1007_p7 }
 0x238   : > { %p1014_p0 = por %p1013_p10, %p1012_p6 }
 0x23a   : > { %p1015_p11 = pnand %p1014_p0, %p1008_p3 }
 0x23c   : > { %1018 = shalt.err (!%p1015_p11)
}
 0x23d   : > { %s1019_s16 = scalar_lea.hbm %s1715_s8, 128  ;;  %s1023_s4 = scalar_lea.hbm %s1775_s2, 256 }
 0x23e   : > { %p1020_p5 = scmp.ne.s32.totalorder %s1715_s8, %s1019_s16  ;;  %p1024_p1 = scmp.lt.u32.totalorder %s1715_s8, %s1775_s2 }
 0x23f   : > { %p1025_p8 = scmp.lt.u32.totalorder %s1023_s4, %s1019_s16  ;;  %p1027_p13 = scmp.lt.u32.totalorder %s1019_s16, %s1715_s8 }
 0x240   : > { %p1021_p4 = pnand %p1020_p5, %p1808_p2 }
 0x241   : > { %p1026_p12 = por %p1025_p8, %p1024_p1 }
 0x242   : > { %p1022_p9 = pneg %p1021_p4 }
 0x243   : > { %p1028_p7 = por %p1027_p13, %p1026_p12 }
 0x245   : > { %p1029_p3 = pnand %p1028_p7, %p1022_p9 }
 0x247   : > { %1032 = shalt.err (!%p1029_p3)
}
 0x248   : > { %837 = dma.vmem_to_hbm [thread:$0]  (%p1808_p2), %s643_s29, 128, %s1715_s8, %s629_s15  }
 0x249 PF: > { %s1809_s6 = sld [smem:[#allocation13_spill]]  ;;  %p851_p6 = scmp.ge.s32.totalorder %s1131_s19, 2 }
 0x24a   : > { %s654_s25 = sand.u32 1, %s1103_s12  }
 0x24b   : > { %s655_s9 = scalar_lea.sflag [#allocation6], %s654_s25 }
 0x24f   : > { %p1810_p10 = scmp.ne.s32.totalorder %s1809_s6, 0 }
 0x251   : > { %p847_p0 = pnand %p851_p6, %p1810_p10 }
 0x253   : > { %1086 = dma.done.wait (!%p847_p0), %s655_s9, 128  }
 0x254   : > { %1088 = vsyncadd (!%p847_p0), %s655_s9, 4294967168  ;;  %s21_s19 = sadd.s32 1, %s1131_s19   ;;  %s1811_s26 = sld [smem:[#allocation14_spill]] }
 0x255   : > { %p18_p11 = scmp.ge.s32.totalorder %s21_s19, 6   ;;  %s1812_s9 = smov %s1095_s10 }
 0x256   : > { %s1813_s10 = smov %s1099_s11  ;;  %s1814_s11 = smov %s1329_s20 }
 0x257   : > { %s1815_s12 = smov %s1107_s13  ;;  %s1816_s13 = smov %s1111_s14 }
 0x258   : > { %s1817_s14 = smov %s1335_s0  ;;  %s1818_s15 = smov %s1123_s17 }
 0x259   : > { %s1819_s16 = smov %s1127_s18  ;;  %s1821_s18 = smov %s1827_s22 }
 0x25a   : > { %s1820_s17 = smov %s1811_s26  ;;  %20 = sbr.rel (!%p18_p11) target bundleno = 13 (0xd), region = 98 }
 0x261   :  { %660 = vsyncpa [#allocation5], 1 }
 0x262   :  { %662 = vsyncpa [#allocation5 + $0x1], 1 }
 0x263   :  { %663 = vsyncpa [#allocation8], 1 }
 0x264   :  { %665 = vsyncpa [#allocation8 + $0x1], 1 }
 0x265   :  { %666 = vsyncpa [#allocation6], 1 }
 0x266   :  { %668 = vsyncpa [#allocation6 + $0x1], 1 }

</bundles_post_ra>
